<compile_context>
chip_gen: v6e
topology: v6e:2x2x1
jax: 0.10.0
libtpu: 0.0.40
codegen_flags: <defaults>
</compile_context>

<pallas_src>
import functools
import math
from typing import NamedTuple

import jax
import jax.numpy as jnp
from jax.experimental import pallas as pl
from jax.experimental.pallas import tpu as pltpu

TM_MAX = 256
TK_MAX = 512


# --------------------------------------------------------------------------
# small helpers
# --------------------------------------------------------------------------
def _round_up(v, m):
    return v + (-v) % m


@functools.lru_cache(maxsize=1)
def _vmem_limit_bytes():
    """Generation-aware scoped-VMEM budget (v7x has 64 MiB/TC vs 128 on v5e/v6e)."""
    cap = 128 * 1024 * 1024
    try:
        cap = int(pltpu.get_tpu_info().vmem_capacity_bytes)
    except Exception:
        pass
    return int(min(max(cap * 2 // 5, 16 * 1024 * 1024), 64 * 1024 * 1024))


def _choose_tm(mp):
    """Row tile: biggest that fits, but keep >=2 grid steps when rows allow it
    so both v7x TensorCores get work on the 'parallel' axis."""
    if mp <= 128:
        return mp
    if mp % 256 == 0 and mp >= 512:
        return 256
    if mp % 128 == 0:
        return 128
    return mp


def _pick_tk(kp):
    if kp <= TK_MAX:
        return kp
    for cand in (512, 384, 256, 128):
        if kp % cand == 0:
            return cand
    return kp


def _edge_tiles(e_cnt):
    if e_cnt <= 1024:
        ep = _round_up(e_cnt, 8)
        return ep, ep
    ep = _round_up(e_cnt, 256)
    return ep, 256


class Act(NamedTuple):
    """Activation kept padded + bf16 between kernels: data is (Mp, Np) with
    Mp = round_up(m, 8), Np = round_up(n, 128); padding is zero."""
    data: jax.Array
    m: int
    n: int


def pack_act(x):
    m, n = x.shape
    mp, np_ = _round_up(m, 8), _round_up(n, 128)
    return Act(jnp.pad(x.astype(jnp.bfloat16), ((0, mp - m), (0, np_ - n))), m, n)


def act_wrap(data, m, n):
    """Wrap an already lane-padded bf16 2-D array; pad rows to a multiple of 8."""
    rows = data.shape[0]
    mp = _round_up(rows, 8)
    if mp != rows:
        data = jnp.pad(data, ((0, mp - rows), (0, 0)))
    return Act(data, m, n)


def unpack_act(a):
    return a.data[:a.m, :a.n].astype(jnp.float32)


def concat_acts(acts):
    m = acts[0].m
    parts = [a.data[:m, :a.n] for a in acts]
    return pack_act(jnp.concatenate(parts, axis=-1))


def _masked_layernorm(y, n_valid, eps=1e-5):
    """LayerNorm over the last dim, ignoring zero-padded columns >= n_valid.
    TODO(synk): no learnable gamma/beta (identity at PyTorch init anyway)."""
    col = jax.lax.broadcasted_iota(jnp.int32, y.shape, y.ndim - 1)
    mask = col < n_valid
    ym = jnp.where(mask, y, 0.0)
    mu = jnp.sum(ym, axis=-1, keepdims=True) / float(n_valid)
    d = jnp.where(mask, y - mu, 0.0)
    var = jnp.sum(d * d, axis=-1, keepdims=True) / float(n_valid)
    out = (y - mu) * jax.lax.rsqrt(var + eps)
    return jnp.where(mask, out, 0.0)


# --------------------------------------------------------------------------
# epilogues fused into the linear kernels
# --------------------------------------------------------------------------
def ep_identity(y):
    return y


def ep_relu(y):
    return jnp.maximum(y, 0.0)


def ep_res_add(y, r):
    return y + r.astype(jnp.float32)


def ep_res_relu(y, r):
    return jnp.maximum(y + r.astype(jnp.float32), 0.0)


def ep_ufo(y, e, m):
    # TODO(synk): UFO module internals not provided; sigmoid-gated residual fusion used.
    g = jax.nn.sigmoid(y)
    return g * e.astype(jnp.float32) + (1.0 - g) * m.astype(jnp.float32)


@functools.lru_cache(maxsize=None)
def make_ep_relu_cols(n_first):
    def ep(y):
        col = jax.lax.broadcasted_iota(jnp.int32, y.shape, y.ndim - 1)
        return jnp.where(col < n_first, jnp.maximum(y, 0.0), y)
    return ep


@functools.lru_cache(maxsize=None)
def make_ep_res_relu_ln(n_valid):
    def ep(y, r):
        return _masked_layernorm(jnp.maximum(y + r.astype(jnp.float32), 0.0), n_valid)
    return ep


@functools.lru_cache(maxsize=None)
def make_ep_add_ln(n_valid):
    def ep(y, r):
        return _masked_layernorm(y + r.astype(jnp.float32), n_valid)
    return ep


# --------------------------------------------------------------------------
# Pallas kernels: fused Linear (bias + epilogue fused, bf16 out)
# --------------------------------------------------------------------------
def _linear_nk1_kernel(*refs, n_extra, epilogue):
    x_ref, w_ref, b_ref = refs[:3]
    extra_refs = refs[3:3 + n_extra]
    o_ref = refs[3 + n_extra]
    y = jnp.dot(x_ref[...], w_ref[...], preferred_element_type=jnp.float32) + b_ref[...]
    o_ref[...] = epilogue(y, *(r[...] for r in extra_refs)).astype(o_ref.dtype)


def _linear_acc_kernel(*refs, nk, n_extra, epilogue):
    x_ref, w_ref, b_ref = refs[:3]
    extra_refs = refs[3:3 + n_extra]
    o_ref = refs[3 + n_extra]
    acc_ref = refs[4 + n_extra]
    k = pl.program_id(1)

    @pl.when(k == 0)
    def _():
        acc_ref[...] = jnp.zeros_like(acc_ref)

    acc_ref[...] += jnp.dot(x_ref[...], w_ref[...], preferred_element_type=jnp.float32)

    @pl.when(k == nk - 1)
    def _():
        y = acc_ref[...] + b_ref[...]
        o_ref[...] = epilogue(y, *(r[...] for r in extra_refs)).astype(o_ref.dtype)


def fused_linear(a, layer, *, extras=(), epilogue=ep_identity):
    """a: Act with data (Mp, Kp) bf16. layer: {'w': (Kp, Npw) bf16, 'b': (1, Npw) f32,
    'out': int}. extras: Acts with (Mp, Npw) data consumed by the epilogue.
    Returns an Act with bf16 (Mp, Npw) data."""
    w, b = layer["w"], layer["b"]
    kp, npw = w.shape
    mp = a.data.shape[0]
    assert a.data.shape[1] == kp, (a.data.shape, w.shape)
    tm = _choose_tm(mp)
    tk = _pick_tk(kp)
    nk = kp // tk
    vmem = _vmem_limit_bytes()

    ex_data = []
    for e in extras:
        assert e.data.shape == (mp, npw), (e.data.shape, (mp, npw))
        ex_data.append(e.data)

    if nk == 1:
        out = pl.pallas_call(
            functools.partial(_linear_nk1_kernel, n_extra=len(extras), epilogue=epilogue),
            out_shape=jax.ShapeDtypeStruct((mp, npw), jnp.bfloat16),
            grid=(mp // tm,),
            in_specs=[pl.BlockSpec((tm, kp), lambda i: (i, 0)),
                      pl.BlockSpec((kp, npw), lambda i: (0, 0)),
                      pl.BlockSpec((1, npw), lambda i: (0, 0))]
                     + [pl.BlockSpec((tm, npw), lambda i: (i, 0)) for _ in extras],
            out_specs=pl.BlockSpec((tm, npw), lambda i: (i, 0)),
            compiler_params=pltpu.CompilerParams(
                dimension_semantics=("parallel",), vmem_limit_bytes=vmem),
        )(a.data, w, b, *ex_data)
    else:
        out = pl.pallas_call(
            functools.partial(_linear_acc_kernel, nk=nk, n_extra=len(extras),
                              epilogue=epilogue),
            out_shape=jax.ShapeDtypeStruct((mp, npw), jnp.bfloat16),
            grid=(mp // tm, nk),
            in_specs=[pl.BlockSpec((tm, tk), lambda i, k: (i, k)),
                      pl.BlockSpec((tk, npw), lambda i, k: (k, 0)),
                      pl.BlockSpec((1, npw), lambda i, k: (0, 0))]
                     + [pl.BlockSpec((tm, npw), lambda i, k: (i, 0)) for _ in extras],
            out_specs=pl.BlockSpec((tm, npw), lambda i, k: (i, 0)),
            scratch_shapes=[pltpu.VMEM((tm, npw), jnp.float32)],
            compiler_params=pltpu.CompilerParams(
                dimension_semantics=("parallel", "arbitrary"), vmem_limit_bytes=vmem),
        )(a.data, w, b, *ex_data)
    return Act(out, a.m, layer["out"])


# --------------------------------------------------------------------------
# Pallas kernel: Fourier embedding fused with Linear_emb
# --------------------------------------------------------------------------
def _fourier_linear_kernel(s_ref, f_ref, w_ref, b_ref, o_ref, *, half):
    phase = s_ref[...] * f_ref[...]                                # (TM, Cp)
    col = jax.lax.broadcasted_iota(jnp.int32, phase.shape, 1)
    feat = jnp.where(col < half, jnp.cos(phase),
                     jnp.where(col < 2 * half, jnp.sin(phase), 0.0))
    y = jnp.dot(feat.astype(jnp.bfloat16), w_ref[...],
                preferred_element_type=jnp.float32) + b_ref[...]
    o_ref[...] = y.astype(o_ref.dtype)


def pallas_fourier_linear(sigma, freqs_row, layer, half):
    """sigma: (B, N) f32 -> Linear_emb(FourierEmbedding(sigma)) as an Act (B*N, C)."""
    b, n = sigma.shape
    m = b * n
    cp, npw = layer["w"].shape
    mp = _round_up(m, 8)
    tm = _choose_tm(mp)
    s2 = jnp.pad(sigma.reshape(m, 1).astype(jnp.float32), ((0, mp - m), (0, 0)))
    out = pl.pallas_call(
        functools.partial(_fourier_linear_kernel, half=half),
        out_shape=jax.ShapeDtypeStruct((mp, npw), jnp.bfloat16),
        grid=(mp // tm,),
        in_specs=[pl.BlockSpec((tm, 1), lambda i: (i, 0)),
                  pl.BlockSpec((1, cp), lambda i: (0, 0)),
                  pl.BlockSpec((cp, npw), lambda i: (0, 0)),
                  pl.BlockSpec((1, npw), lambda i: (0, 0))],
        out_specs=pl.BlockSpec((tm, npw), lambda i: (i, 0)),
        compiler_params=pltpu.CompilerParams(
            dimension_semantics=("parallel",), vmem_limit_bytes=_vmem_limit_bytes()),
    )(s2, freqs_row, layer["w"], layer["b"])
    return Act(out, m, layer["out"])


# --------------------------------------------------------------------------
# Pallas kernel: multi-head attention on a fused (T, 3*Dp) q|k|v slab.
# One batch per grid step; heads = static lane slices; per-head result stored
# directly at its static lane offset (no concatenate relayout).
# --------------------------------------------------------------------------
def _mha_kernel(qkv_ref, o_ref, *, nheads, dh, d_valid, dp, t_valid, scale):
    tp = o_ref.shape[1]
    if o_ref.shape[2] > d_valid:
        o_ref[...] = jnp.zeros_like(o_ref)       # zero padded lanes once
    kmask = jax.lax.broadcasted_iota(jnp.int32, (tp, tp), 1) < t_valid
    for h in range(nheads):
        lo = h * dh
        qh = qkv_ref[0, :, lo:lo + dh]                           # (Tp, dh) bf16
        kh = qkv_ref[0, :, dp + lo:dp + lo + dh]
        vh = qkv_ref[0, :, 2 * dp + lo:2 * dp + lo + dh]
        s = jax.lax.dot_general(qh, kh, (((1,), (1,)), ((), ())),
                                preferred_element_type=jnp.float32) * scale
        s = jnp.where(kmask, s, -1e30)
        s = s - jnp.max(s, axis=-1, keepdims=True)
        p = jnp.exp(s)
        l = jnp.sum(p, axis=-1, keepdims=True)
        oh = jax.lax.dot_general(p.astype(jnp.bfloat16), vh,
                                 (((1,), (0,)), ((), ())),
                                 preferred_element_type=jnp.float32)
        o_ref[0, :, lo:lo + dh] = (oh * pl.reciprocal(l, approx=True)).astype(o_ref.dtype)


def pallas_mha(qkv3, nheads, d_valid, dp, t_valid):
    """qkv3: (B, Tp, 3*Dp) bf16 with q/k/v at lane offsets 0/Dp/2Dp. -> (B, Tp, Dp) bf16."""
    # TODO(synk): flash-style KV-tiled variant needed for very long edge sequences
    # (v7x 64 MiB VMEM); the full (Tp,Tp) score block is fine at these sizes.
    bsz, tp, _ = qkv3.shape
    dh = d_valid // nheads
    scale = 1.0 / math.sqrt(dh)
    return pl.pallas_call(
        functools.partial(_mha_kernel, nheads=nheads, dh=dh, d_valid=d_valid,
                          dp=dp, t_valid=t_valid, scale=scale),
        out_shape=jax.ShapeDtypeStruct((bsz, tp, dp), jnp.bfloat16),
        grid=(bsz,),
        in_specs=[pl.BlockSpec((1, tp, 3 * dp), lambda b: (b, 0, 0))],
        out_specs=pl.BlockSpec((1, tp, dp), lambda b: (b, 0, 0)),
        compiler_params=pltpu.CompilerParams(
            dimension_semantics=("parallel",), vmem_limit_bytes=_vmem_limit_bytes()),
    )(qkv3)


def mha_block(p, x_act, bsz, t, nheads, *, ln_dim):
    """Fused QKV projection + MHA + (output proj fused with residual-add + LayerNorm)."""
    d = ln_dim
    dp = _round_up(d, 128)
    qkv = fused_linear(x_act, p["qkv"])                    # Act (Mp, 3*Dp) bf16
    m = bsz * t
    qkv2 = qkv.data if qkv.data.shape[0] == m else qkv.data[:m]
    tp = _round_up(t, 8)
    qkv3 = qkv2.reshape(bsz, t, 3 * dp)
    if tp != t:
        qkv3 = jnp.pad(qkv3, ((0, 0), (0, tp - t), (0, 0)))
    attn3 = pallas_mha(qkv3, nheads, d, dp, t)             # (B, Tp, Dp) bf16
    attn2 = (attn3 if tp == t else attn3[:, :t]).reshape(m, dp)
    attn_act = act_wrap(attn2, m, d)
    return fused_linear(attn_act, p["o"], extras=(x_act,), epilogue=make_ep_add_ln(d))


# --------------------------------------------------------------------------
# Pallas kernel: edge-endpoint gather + Prj_preAtt lin1 (+ skip) in one pass.
# cat(x[:,i_node], x[:,j_node], edge) @ [W1|Wskip] computed as three matmuls
# against row-split weights, with the node gathers done via one-hot MXU ops --
# no (B, E, 4C+A) HBM tensor and no XLA gather.
# --------------------------------------------------------------------------
def _edge_prj_kernel(ii_ref, jj_ref, xc_ref, e_ref, w1_ref, w2_ref, w3_ref, b_ref,
                     o_ref, *, relu_n):
    te = ii_ref.shape[0]
    nn = xc_ref.shape[1]
    niota = jax.lax.broadcasted_iota(jnp.int32, (te, nn), 1)
    oh_i = (niota == ii_ref[...]).astype(jnp.bfloat16)        # (TE, Nnp)
    oh_j = (niota == jj_ref[...]).astype(jnp.bfloat16)
    xc = xc_ref[0]                                            # (Nnp, Cxp) bf16
    xi = jnp.dot(oh_i, xc, preferred_element_type=jnp.bfloat16)   # exact gather
    xj = jnp.dot(oh_j, xc, preferred_element_type=jnp.bfloat16)
    y = jnp.dot(xi, w1_ref[...], preferred_element_type=jnp.float32)
    y += jnp.dot(xj, w2_ref[...], preferred_element_type=jnp.float32)
    y += jnp.dot(e_ref[0], w3_ref[...], preferred_element_type=jnp.float32)
    y += b_ref[...]
    col = jax.lax.broadcasted_iota(jnp.int32, y.shape, 1)
    y = jnp.where(col < relu_n, jnp.maximum(y, 0.0), y)       # ReLU on the lin1 half only
    o_ref[0] = y.astype(o_ref.dtype)


def pallas_edge_prj(prj, xcat_act, edge_ij, i_node, j_node, bsz, n_nodes):
    e_cnt, a_dim = edge_ij.shape[1], edge_ij.shape[2]
    cxp = xcat_act.data.shape[1]
    nnp = _round_up(n_nodes, 8)
    ap = _round_up(a_dim, 128)
    wn = prj["edge_b"].shape[1]
    npart = prj["np_part"]

    xc3 = xcat_act.data[:bsz * n_nodes].reshape(bsz, n_nodes, cxp)
    if nnp != n_nodes:
        xc3 = jnp.pad(xc3, ((0, 0), (0, nnp - n_nodes), (0, 0)))

    ep, te = _edge_tiles(e_cnt)
    edge_p = jnp.pad(edge_ij.astype(jnp.bfloat16),
                     ((0, 0), (0, ep - e_cnt), (0, ap - a_dim)))
    ii = jnp.pad(i_node.astype(jnp.int32), (0, ep - e_cnt)).reshape(ep, 1)
    jj = jnp.pad(j_node.astype(jnp.int32), (0, ep - e_cnt)).reshape(ep, 1)

    out = pl.pallas_call(
        functools.partial(_edge_prj_kernel, relu_n=npart),
        out_shape=jax.ShapeDtypeStruct((bsz, ep, wn), jnp.bfloat16),
        grid=(bsz, ep // te),
        in_specs=[pl.BlockSpec((te, 1), lambda b, t: (t, 0)),
                  pl.BlockSpec((te, 1), lambda b, t: (t, 0)),
                  pl.BlockSpec((1, nnp, cxp), lambda b, t: (b, 0, 0)),
                  pl.BlockSpec((1, te, ap), lambda b, t: (b, t, 0)),
                  pl.BlockSpec(prj["edge_w1"].shape, lambda b, t: (0, 0)),
                  pl.BlockSpec(prj["edge_w2"].shape, lambda b, t: (0, 0)),
                  pl.BlockSpec(prj["edge_w3"].shape, lambda b, t: (0, 0)),
                  pl.BlockSpec((1, wn), lambda b, t: (0, 0))],
        out_specs=pl.BlockSpec((1, te, wn), lambda b, t: (b, t, 0)),
        compiler_params=pltpu.CompilerParams(
            dimension_semantics=("parallel", "parallel"),
            vmem_limit_bytes=_vmem_limit_bytes()),
    )(ii, jj, xc3, edge_p, prj["edge_w1"], prj["edge_w2"], prj["edge_w3"], prj["edge_b"])

    m = bsz * e_cnt
    out2 = (out if ep == e_cnt else out[:, :e_cnt]).reshape(m, wn)
    h = act_wrap(out2[:, :npart], m, prj["out"])
    skip = act_wrap(out2[:, npart:], m, prj["out"])
    return h, skip


# --------------------------------------------------------------------------
# Pallas kernel: scatter-add (edges -> nodes) fused with LayerNorm (LN1).
# bf16 one-hot (0/1 exact), f32 MXU accumulation, one launch over batch.
# --------------------------------------------------------------------------
def _scatter_ln_kernel(idx_ref, edge_ref, o_ref, *, a_valid, eps):
    idx = idx_ref[...]                                    # (1, Ep) int32
    n_rows = o_ref.shape[1]
    row = jax.lax.broadcasted_iota(jnp.int32, (n_rows, idx.shape[1]), 0)
    onehot = (row == idx).astype(jnp.bfloat16)            # (Nnp, Ep)
    acc = jnp.dot(onehot, edge_ref[0], preferred_element_type=jnp.float32)
    o_ref[0] = _masked_layernorm(acc, a_valid, eps).astype(o_ref.dtype)


def pallas_scatter_ln(e_act, i_node, bsz, e_cnt, n_nodes):
    a_dim = e_act.n
    ap = e_act.data.shape[1]
    ep = _round_up(e_cnt, 8)
    nnp = _round_up(n_nodes, 8)
    e3 = e_act.data[:bsz * e_cnt].reshape(bsz, e_cnt, ap)
    if ep != e_cnt:
        e3 = jnp.pad(e3, ((0, 0), (0, ep - e_cnt), (0, 0)))
    idx = jnp.pad(i_node.astype(jnp.int32), (0, ep - e_cnt),
                  constant_values=-1).reshape(1, ep)
    out = pl.pallas_call(
        functools.partial(_scatter_ln_kernel, a_valid=a_dim, eps=1e-5),
        out_shape=jax.ShapeDtypeStruct((bsz, nnp, ap), jnp.bfloat16),
        grid=(bsz,),
        in_specs=[pl.BlockSpec((1, ep), lambda b: (0, 0)),
                  pl.BlockSpec((1, ep, ap), lambda b: (b, 0, 0))],
        out_specs=pl.BlockSpec((1, nnp, ap), lambda b: (b, 0, 0)),
        compiler_params=pltpu.CompilerParams(
            dimension_semantics=("parallel",), vmem_limit_bytes=_vmem_limit_bytes()),
    )(idx, e3)
    m = bsz * n_nodes
    out2 = (out if nnp == n_nodes else out[:, :n_nodes]).reshape(m, ap)
    return act_wrap(out2, m, a_dim)


# --------------------------------------------------------------------------
# parameter init (weights padded + bf16 once; fused QKV / lin1+skip weights)
# --------------------------------------------------------------------------
def _raw_linear(key, in_dim, out_dim):
    kw, kb = jax.random.split(key)
    s = 1.0 / math.sqrt(in_dim)
    w = jax.random.uniform(kw, (in_dim, out_dim), jnp.float32, -s, s)
    b = jax.random.uniform(kb, (out_dim,), jnp.float32, -s, s)
    return w, b


def _pack_w(w):
    kp, np_ = _round_up(w.shape[0], 128), _round_up(w.shape[1], 128)
    return jnp.pad(w, ((0, kp - w.shape[0]), (0, np_ - w.shape[1]))).astype(jnp.bfloat16)


def _pack_b(b):
    np_ = _round_up(b.shape[0], 128)
    return jnp.pad(b, (0, np_ - b.shape[0])).reshape(1, np_).astype(jnp.float32)


def init_linear(key, in_dim, out_dim):
    w, b = _raw_linear(key, in_dim, out_dim)
    return {"w": _pack_w(w), "b": _pack_b(b), "out": out_dim}


def _fuse_n(layers):
    """Concatenate padded layers along the output (lane) axis -> one wide matmul."""
    return {"w": jnp.concatenate([l["w"] for l in layers], axis=1),
            "b": jnp.concatenate([l["b"] for l in layers], axis=1),
            "out": int(sum(l["w"].shape[1] for l in layers))}


def init_attention(key, dim):
    kq, kk, kv, ko = jax.random.split(key, 4)
    qkv = _fuse_n([init_linear(kq, dim, dim), init_linear(kk, dim, dim),
                   init_linear(kv, dim, dim)])
    return {"qkv": qkv, "o": init_linear(ko, dim, dim)}


def init_reslayer(key, in_dim, out_dim):
    # TODO(synk): ResLayer class definition not provided; assumed
    # Linear->ReLU->Linear (+ projected residual) -> act2 -> LayerNorm.
    k1, k2, k3 = jax.random.split(key, 3)
    p = {"lin2": init_linear(k2, out_dim, out_dim), "out": out_dim,
         "np_part": _round_up(out_dim, 128)}
    lin1 = init_linear(k1, in_dim, out_dim)
    if in_dim != out_dim:
        p["lin1skip"] = _fuse_n([lin1, init_linear(k3, in_dim, out_dim)])
    else:
        p["lin1"] = lin1
    return p


def init_prj_pre(key, c, a):
    """ResLayer(4C+A -> A) with lin1/skip weights pre-split by input segment
    ([x_i | x_j | edge]) and fused along N for the edge-gather kernel."""
    k1, k2, k3 = jax.random.split(key, 3)
    in_dim = 4 * c + a
    w1, b1 = _raw_linear(k1, in_dim, a)
    ws, bs = _raw_linear(k3, in_dim, a)

    def seg(lo, hi):
        return jnp.concatenate([_pack_w(w1[lo:hi]), _pack_w(ws[lo:hi])], axis=1)

    return {"edge_w1": seg(0, 2 * c),
            "edge_w2": seg(2 * c, 4 * c),
            "edge_w3": seg(4 * c, in_dim),
            "edge_b": jnp.concatenate([_pack_b(b1), _pack_b(bs)], axis=1),
            "lin2": init_linear(k2, a, a),
            "np_part": _round_up(a, 128), "out": a}


def init_params(key, c, a, natts):
    keys = jax.random.split(key, 8)
    freqs = jax.random.normal(keys[0], (c // 2,), jnp.float32) * 16.0 * 2.0 * math.pi
    cp = _round_up(c, 128)
    freqs_row = jnp.zeros((1, cp), jnp.float32).at[0, :c].set(
        jnp.concatenate([freqs, freqs]))
    p = {"freqs_row": freqs_row, "half": c // 2,
         "lin_emb": init_linear(keys[1], c, c),
         "lin_x": init_linear(keys[2], 3, c),
         "prj_pre": init_prj_pre(keys[3], c, a),
         "ufo": init_linear(keys[4], a, a),
         "decoder": init_attention(keys[6], a),
         "prj_out": init_reslayer(keys[7], a, 3)}
    blocks = []
    for i in range(natts):
        kb = jax.random.fold_in(keys[5], i)
        k1, k2 = jax.random.split(kb)
        blocks.append({"mha": init_attention(k1, a), "ffn": init_reslayer(k2, a, a)})
    p["att_blocks"] = blocks
    return p


# --------------------------------------------------------------------------
# sub-module forward functions
# --------------------------------------------------------------------------
def reslayer_apply(p, x_act, *, relu_out=True, ln=True):
    n_out = p["out"]
    npart = p["np_part"]
    if "lin1skip" in p:
        # lin1 and skip projection share x -> one wide matmul, ReLU on first half.
        wide = fused_linear(x_act, p["lin1skip"], epilogue=make_ep_relu_cols(npart))
        h = Act(wide.data[:, :npart], wide.m, n_out)
        skip = Act(wide.data[:, npart:2 * npart], wide.m, n_out)
    else:
        h = fused_linear(x_act, p["lin1"], epilogue=ep_relu)
        skip = x_act
    if relu_out and ln:
        ep = make_ep_res_relu_ln(n_out)
    elif relu_out:
        ep = ep_res_relu
    else:
        ep = ep_res_add
    return fused_linear(h, p["lin2"], extras=(skip,), epilogue=ep)


def prj_pre_apply(prj, xcat_act, edge_ij, i_node, j_node, bsz, n_nodes):
    h, skip = pallas_edge_prj(prj, xcat_act, edge_ij, i_node, j_node, bsz, n_nodes)
    return fused_linear(h, prj["lin2"], extras=(skip,),
                        epilogue=make_ep_res_relu_ln(prj["out"]))


def att_block_apply(p, e_act, bsz, e_cnt, a_dim, nheads):
    # TODO(synk): Attention_Block internals / idx_i_edge,idx_j_edge sparse-attention
    # pattern not provided; dense edge self-attention + residual LN + ResLayer FFN used.
    h = mha_block(p["mha"], e_act, bsz, e_cnt, nheads, ln_dim=a_dim)
    return reslayer_apply(p["ffn"], h)


def ufo_apply(p, e_act, mem_act):
    out = fused_linear(e_act, p, extras=(e_act, mem_act), epilogue=ep_ufo)
    return out, out


# --------------------------------------------------------------------------
# NoiseIdentifier.forward
# --------------------------------------------------------------------------
def noise_identifier_forward(params, x, sigma, edge_ij, i_node, j_node,
                             idx_i_edge, idx_j_edge, *, nheads, natts, n_nodes):
    del idx_i_edge, idx_j_edge  # TODO(synk): sparse edge-attention indices unused (dense guess)
    bsz, n, _ = x.shape
    e_cnt = edge_ij.shape[1]
    a = params["prj_pre"]["out"]

    # emb = Linear_emb(FourierEmbedding(sigma))  (one fused kernel)
    emb = pallas_fourier_linear(sigma, params["freqs_row"],
                                params["lin_emb"], params["half"])
    # x = Linear_x(x) ; x = cat(emb, x)
    xh = fused_linear(pack_act(x.reshape(bsz * n, 3)), params["lin_x"])
    xcat = concat_acts([emb, xh])

    # edge_ij = Prj_preAtt(cat(x[:,i_node], x[:,j_node], edge_ij))
    #   gather + lin1 + skip fused in one kernel; lin2 + residual + ReLU + LN fused
    e_act = prj_pre_apply(params["prj_pre"], xcat, edge_ij, i_node, j_node, bsz, n_nodes)
    mem_act = e_act

    for blk in params["att_blocks"]:
        e_act = att_block_apply(blk, e_act, bsz, e_cnt, a, nheads)
        e_act, mem_act = ufo_apply(params["ufo"], e_act, mem_act)

    # x1 = LN1(scatter_add(edge_ij, i_node))  (fused)
    x1 = pallas_scatter_ln(e_act, i_node, bsz, e_cnt, n_nodes)
    # x = LN2(Attention_Decoder(x1) + x1)  (residual-add + LN fused into the o-proj)
    # TODO(synk): NodeAttentionLayer's use of i_node/j_node not provided; dense node attention.
    xa = mha_block(params["decoder"], x1, bsz, n_nodes, nheads, ln_dim=a)
    # out = Prj_out(x)   (ResLayer A->3, no act2/norm)
    out = reslayer_apply(params["prj_out"], xa, relu_out=False, ln=False)
    return unpack_act(out).reshape(bsz, n_nodes, 3)


# --------------------------------------------------------------------------
# main
# --------------------------------------------------------------------------
if __name__ == "__main__":
    # small shapes consistent with the module (scaled down from 256/512/8)
    C, A, H, NATT = 32, 64, 4, 2      # num_channels, att_dim, nheads, natts
    B, N, E = 2, 8, 16                # batch, nodes, edges

    key = jax.random.PRNGKey(0)
    kp, kx, ks, ke, ki, kj, kii, kjj = jax.random.split(key, 8)

    params = init_params(kp, C, A, NATT)

    x = jax.random.normal(kx, (B, N, 3), jnp.float32)
    sigma = jax.random.uniform(ks, (B, N), jnp.float32, 0.1, 1.0)
    edge_ij = jax.random.normal(ke, (B, E, A), jnp.float32)
    i_node = jax.random.randint(ki, (E,), 0, N)
    j_node = jax.random.randint(kj, (E,), 0, N)
    idx_i_edge = jax.random.randint(kii, (E,), 0, E)
    idx_j_edge = jax.random.randint(kjj, (E,), 0, E)

    out = noise_identifier_forward(
        params, x, sigma, edge_ij, i_node, j_node, idx_i_edge, idx_j_edge,
        nheads=H, natts=NATT, n_nodes=N)
    out = jax.block_until_ready(out)

    assert out.shape == (B, N, 3), out.shape
    assert bool(jnp.all(jnp.isfinite(out)))
    print("KERNEL_OK")
</pallas_src>

<mosaic_0001>
module attributes {stable_mosaic.version = 11 : i64} {
  func.func @_fourier_linear_kernel(%arg0: i32, %arg1: memref<16x1xf32, #tpu.memory_space<vmem>>, %arg2: memref<1x128xf32, #tpu.memory_space<vmem>>, %arg3: memref<128x128xbf16, #tpu.memory_space<vmem>>, %arg4: memref<1x128xf32, #tpu.memory_space<vmem>>, %arg5: memref<16x128xbf16, #tpu.memory_space<vmem>>) attributes {dimension_semantics = [#tpu.dimension_semantics<parallel>], iteration_bounds = array<i64: 1>, scalar_prefetch = 0 : i64, scratch_operands = 0 : i64, tpu.core_type = #tpu.core_type<tc>, window_params = [{transform_indices = @transform_0, window_bounds = array<i64: 16, 1>}, {pipeline_mode = #tpu.pipeline_mode<synchronous>, transform_indices = @transform_1, window_bounds = array<i64: 1, 128>}, {pipeline_mode = #tpu.pipeline_mode<synchronous>, transform_indices = @transform_2, window_bounds = array<i64: 128, 128>}, {pipeline_mode = #tpu.pipeline_mode<synchronous>, transform_indices = @transform_3, window_bounds = array<i64: 1, 128>}, {transform_indices = @transform_4, window_bounds = array<i64: 16, 128>}]} {
    %c0 = arith.constant 0 : index
    %c0_0 = arith.constant 0 : index
    %0 = vector.load %arg1[%c0, %c0_0] : memref<16x1xf32, #tpu.memory_space<vmem>>, vector<16x1xf32>
    %c0_1 = arith.constant 0 : index
    %c0_2 = arith.constant 0 : index
    %1 = vector.load %arg2[%c0_1, %c0_2] : memref<1x128xf32, #tpu.memory_space<vmem>>, vector<1x128xf32>
    %2 = vector.broadcast %0 : vector<16x1xf32> to vector<16x128xf32>
    %3 = vector.broadcast %1 : vector<1x128xf32> to vector<16x128xf32>
    %4 = arith.mulf %2, %3 : vector<16x128xf32>
    %5 = tpu.iota {dimensions = array<i32: 1>} : vector<16x128xi32>
    %c16_i32 = arith.constant 16 : i32
    %6 = vector.broadcast %c16_i32 : i32 to vector<16x128xi32>
    %7 = arith.cmpi slt, %5, %6 : vector<16x128xi32>
    %8 = math.cos %4 : vector<16x128xf32>
    %c32_i32 = arith.constant 32 : i32
    %9 = vector.broadcast %c32_i32 : i32 to vector<16x128xi32>
    %10 = arith.cmpi slt, %5, %9 : vector<16x128xi32>
    %11 = math.sin %4 : vector<16x128xf32>
    %cst = arith.constant 0.000000e+00 : f32
    %12 = vector.broadcast %cst : f32 to vector<16x128xf32>
    %13 = arith.select %10, %11, %12 : vector<16x128xi1>, vector<16x128xf32>
    %14 = arith.select %7, %8, %13 : vector<16x128xi1>, vector<16x128xf32>
    %15 = arith.truncf %14 : vector<16x128xf32> to vector<16x128xbf16>
    %c0_3 = arith.constant 0 : index
    %c0_4 = arith.constant 0 : index
    %16 = vector.load %arg3[%c0_3, %c0_4] : memref<128x128xbf16, #tpu.memory_space<vmem>>, vector<128x128xbf16>
    %cst_5 = arith.constant dense<0.000000e+00> : vector<16x128xf32>
    %17 = tpu.matmul %15, %16, %cst_5 {dimension_numbers = #tpu.dot_dimension_numbers<[1], [0], [0], [1], [0, 0, 1, 1], [], []>} : vector<16x128xbf16>, vector<128x128xbf16>, vector<16x128xf32> -> vector<16x128xf32>
    %c0_6 = arith.constant 0 : index
    %c0_7 = arith.constant 0 : index
    %18 = vector.load %arg4[%c0_6, %c0_7] : memref<1x128xf32, #tpu.memory_space<vmem>>, vector<1x128xf32>
    %19 = vector.broadcast %18 : vector<1x128xf32> to vector<16x128xf32>
    %20 = arith.addf %17, %19 : vector<16x128xf32>
    %21 = arith.truncf %20 : vector<16x128xf32> to vector<16x128xbf16>
    %c0_8 = arith.constant 0 : index
    %c0_9 = arith.constant 0 : index
    %22 = vector.load %arg5[%c0_8, %c0_9] : memref<16x128xbf16, #tpu.memory_space<vmem>>, vector<16x128xbf16>
    tpu.vector_store %arg5[%c0_8, %c0_9], %21 {strides = array<i32>} : memref<16x128xbf16, #tpu.memory_space<vmem>>, vector<16x128xbf16>,
    return
  }
  func.func @transform_0(%arg0: i32) -> (i32, i32) {
    %c0_i32 = arith.constant 0 : i32
    %c0_i32_0 = arith.constant 0 : i32
    return %arg0, %c0_i32 : i32, i32
  }
  func.func @transform_1(%arg0: i32) -> (i32, i32) {
    %c0_i32 = arith.constant 0 : i32
    %c0_i32_0 = arith.constant 0 : i32
    %c0_i32_1 = arith.constant 0 : i32
    return %c0_i32, %c0_i32_0 : i32, i32
  }
  func.func @transform_2(%arg0: i32) -> (i32, i32) {
    %c0_i32 = arith.constant 0 : i32
    %c0_i32_0 = arith.constant 0 : i32
    %c0_i32_1 = arith.constant 0 : i32
    return %c0_i32, %c0_i32_0 : i32, i32
  }
  func.func @transform_3(%arg0: i32) -> (i32, i32) {
    %c0_i32 = arith.constant 0 : i32
    %c0_i32_0 = arith.constant 0 : i32
    %c0_i32_1 = arith.constant 0 : i32
    return %c0_i32, %c0_i32_0 : i32, i32
  }
  func.func @transform_4(%arg0: i32) -> (i32, i32) {
    %c0_i32 = arith.constant 0 : i32
    %c0_i32_0 = arith.constant 0 : i32
    return %arg0, %c0_i32 : i32, i32
  }
}

</mosaic_0001>

<bundles_post_ra>
// kernel: tpu_custom_call.1
= control target key start
LH: loop header
LB: loop body
LE: loop exit
PB: predicated region body
PF: predicated region fallthrough
CT: control target
= control target key end

     0   :  { %9 = vsyncpa [#allocation3], 0  ;;  %s904_s0 = inlined_call_operand.vmem [shape: f32[16,1], index: 0, kind: input, shape index: {}]   ;;  %s905_s1 = inlined_call_operand.vmem [shape: f32[1,128], index: 1, kind: input, shape index: {}]   ;;  %s906_s2 = inlined_call_operand.hbm [shape: bf16[128,128], index: 2, kind: input, shape index: {}]   ;;  %s907_s3 = inlined_call_operand.vmem [shape: f32[1,128], index: 3, kind: input, shape index: {}]   ;;  %s908_s4 = inlined_call_operand.hbm [shape: bf16[16,128], index: 4, kind: output, shape index: {}]  }
   0x1   :  { %10 = vsyncpa [#allocation4], 0  ;;  %s762_s15 = smov [#allocation2]  }
   0x2   :  { %s20_s16 = sshll.u32 %s762_s15, 4  ;;  %s21_s16 = int_to_ptr.vmem [resolvable:$true] %s20_s16 }
   0x3   :  { %s726_s17 = scalar_lea.vmem %s21_s16, 1024  ;;  %p731_p1 = scmp.lt.s32.totalorder %s21_s16, %s21_s16 }
   0x4   :  { %p727_p0 = scmp.ne.s32.totalorder %s21_s16, %s726_s17  ;;  %p732_p2 = scmp.lt.s32.totalorder %s726_s17, %s726_s17 }
   0x6   :  { %p733_p3 = por %p732_p2, %p731_p1 }
   0x8   :  { %p734_p4 = pnand %p733_p3, %p727_p0 }
   0xa   :  { %737 = shalt.err (!%p734_p4)
}
   0xb   :  { %s763_s18 = smov 64   ;;  %s764_s19 = smov 4  }
   0xc   :  { %26 = dma.hbm_to_vmem [thread:$0]  %s906_s2, 1024, %s21_s16, [#allocation3], %s763_s18, %s763_s18, %s764_s19  }
   0xd   :  { %758 = dma.done.wait [#allocation3], 1024  }
   0xe   :  { %759 = vsyncadd [#allocation3], 4294966272  ;;  %v765_v0 = vmov 0   ;;  %v33_v1 = vld [vmem:[%s904_s0] sm:$0xff]  ;;  %v34_v2 = vld [vmem:[%s904_s0 + $0x8] sm:$0xff]  ;;  %v766_v4 = vmov 0.0  }
   0xf   :  { %701 = vset.pattern.permute.xlu0 %v765_v0  ;;  %v702_v3 = vld [vmem:[#allocation2 + $0x38] sm:$0xff]   ;;  %660 = vmatprep.subr.bf16.mxu0 %v766_v4  ;;  %v703_v5 = vld [vmem:[#allocation2 + $0x30] sm:$0xff]   ;;  %v704_v6 = vld [vmem:[#allocation2 + $0x28] sm:$0xff]   ;;  %vm767_vm0 = vmmov 0   ;;  %v768_v33 = vmov 683565275  }
  0x10   :  { %38 = vperm.xlu0 %701, %v33_v1   ;;  %661 = vmatpush3.bf16.msra.mxu0 %v702_v3  ;;  %v705_v7 = vld [vmem:[#allocation2 + $0x20] sm:$0xff]   ;;  %v706_v8 = vld [vmem:[#allocation2 + $0x18] sm:$0xff]   ;;  %v707_v9 = vld [vmem:[#allocation2 + $0x10] sm:$0xff]   ;;  %v769_v37 = vmov 2475754826   ;;  %s774_s27 = smov [#allocation5]  }
  0x11   :  { %662 = vmatprep.subr.bf16.mxu0 %v766_v4  ;;  %676 = vmatprep.mubr.msk.bf16.mxu0 %vm767_vm0, %v766_v4  ;;  %v708_v10 = vld [vmem:[#allocation2 + $0x8] sm:$0xff]   ;;  %v709_v11 = vld [vmem:[#allocation2] sm:$0xff]   ;;  %v770_v39 = vmov 2131351028   ;;  %v771_v41 = vmov 2102212464  }
  0x12   :  { %v616_v12 = vld [vmem:[%s905_s1] ss:$0 sm:$0xff]  ;;  %v772_v43 = vmov 920167782   ;;  %v773_v50 = vmov 1326507024  }
  0x13   :  { %s604_s28 = sshll.u32 %s774_s27, 4  ;;  %s605_s28 = int_to_ptr.vmem [resolvable:$true] %s604_s28 }
  0x14   :  { %43 = vperm.xlu0 %701, %v34_v2   ;;  %663 = vmatpush3.bf16.msra.mxu0 %v703_v5  ;;  %s738_s29 = scalar_lea.vmem %s605_s28, 128  ;;  %p743_p6 = scmp.lt.s32.totalorder %s605_s28, %s605_s28 }
  0x15   :  { %664 = vmatprep.subr.bf16.mxu0 %v766_v4  ;;  %p739_p5 = scmp.ne.s32.totalorder %s605_s28, %s738_s29  ;;  %p744_p7 = scmp.lt.s32.totalorder %s738_s29, %s738_s29 }
  0x17   :  { %p745_p8 = por %p744_p7, %p743_p6 }
  0x18   :  { %665 = vmatpush3.bf16.msra.mxu0 %v704_v6 }
  0x19   :  { %666 = vmatprep.subr.bf16.mxu0 %v766_v4  ;;  %p746_p9 = pnand %p745_p8, %p739_p5 }
  0x1c   :  { %667 = vmatpush3.bf16.msra.mxu0 %v705_v7 }
  0x1d   :  { %668 = vmatprep.subr.bf16.mxu0 %v766_v4 }
  0x20   :  { %669 = vmatpush3.bf16.msra.mxu0 %v706_v8 }
  0x21   :  { %670 = vmatprep.subr.bf16.mxu0 %v766_v4 }
  0x24   :  { %671 = vmatpush3.bf16.msra.mxu0 %v707_v9 }
  0x25   :  { %672 = vmatprep.subr.bf16.mxu0 %v766_v4 }
  0x28   :  { %673 = vmatpush3.bf16.msra.mxu0 %v708_v10 }
  0x29   :  { %674 = vmatprep.subr.bf16.mxu0 %v766_v4 }
  0x2c   :  { %675 = vmatpush3.bf16.msra.mxu0 %v709_v11 }
  0x8b   :  { %v39_v13 = vpop.permute.xlu0 %38 }
  0x8c   :  { %v815_v14 = vmul.f32 %v616_v12, %v39_v13 }
  0x8e   :  { %v57_v15 = vand.u32 2147483647, %v815_v14  ;;  %v60_v16 = vand.u32 2139095040, %v815_v14  ;;  %vm59_vm15 = vcmp.lt.s32.totalorder %v815_v14, 0 }
  0x8f   :  { %v44_v17 = vpop.permute.xlu0 %43 }
  0x90   :  { %v61_v18 = vshrl.u32 %v60_v16, 23  ;;  %v819_v19 = vmul.f32 %v616_v12, %v44_v17  ;;  %v64_v20 = vand.u32 8388607, %v57_v15  ;;  %vm868_vm0 = vcmp.le.f32.partialorder %v57_v15, 0.7853982 }
  0x92   :  { %v617_v21 = vadd.s32 4294967169, %v61_v18  ;;  %v163_v22 = vand.u32 2139095040, %v819_v19  ;;  %v65_v24 = vor.u32 8388608, %v64_v20  ;;  %v160_v26 = vand.u32 2147483647, %v819_v19 }
  0x94   :  { %v67_v23 = vadd.s32 1, %v617_v21  ;;  %v164_v25 = vshrl.u32 %v163_v22, 23  ;;  %v825_v31 = vshll.u32 %v65_v24, 8  ;;  %v167_v35 = vand.u32 8388607, %v160_v26 }
  0x96   :  { %vm68_vm1 = vcmp.gt.s32.totalorder %v67_v23, 0  ;;  %v621_v28 = vadd.s32 4294967169, %v164_v25  ;;  %v168_v1 = vor.u32 8388608, %v167_v35 }
  0x97   :  { %v69_v27 = vsel %vm68_vm1, %v67_v23, 0  ;;  %vm162_vm1 = vcmp.lt.s32.totalorder %v819_v19, 0 }
  0x98   :  { %v70_v29 = vshrl.u32 %v69_v27, 5  ;;  %v71_v30 = vand.u32 31, %v69_v27  ;;  %v170_v36 = vadd.s32 1, %v621_v28  ;;  %v208_v16 = vshll.u32 %v168_v1, 8 }
  0x9a   :  { %v72_v32 = vsub.s32 32, %v71_v30  ;;  %v74_v34 = vshll.u32 %v768_v33, %v71_v30  ;;  %v77_v38 = vshll.u32 %v769_v37, %v71_v30  ;;  %v80_v40 = vshll.u32 %v770_v39, %v71_v30 }
  0x9b   :  { %v83_v42 = vshll.u32 %v771_v41, %v71_v30  ;;  %v86_v44 = vshll.u32 %v772_v43, %v71_v30  ;;  %vm89_vm2 = vcmp.lt.s32.totalorder %v70_v29, 1  ;;  %vm91_vm3 = vcmp.lt.s32.totalorder %v70_v29, 3 }
  0x9c   :  { %v75_v45 = vshrl.u32 %v769_v37, %v72_v32  ;;  %v78_v46 = vshrl.u32 %v770_v39, %v72_v32  ;;  %v81_v47 = vshrl.u32 %v771_v41, %v72_v32  ;;  %v73_v48 = vshrl.u32 %v768_v33, %v72_v32 }
  0x9d   :  { %v84_v49 = vshrl.u32 %v772_v43, %v72_v32  ;;  %v87_v51 = vshrl.u32 %v773_v50, %v72_v32  ;;  %vm171_vm4 = vcmp.gt.s32.totalorder %v170_v36, 0  ;;  %vm92_vm5 = vcmp.lt.s32.totalorder %v70_v29, 4 }
  0x9e   :  { %v76_v52 = vor.u32 %v75_v45, %v74_v34  ;;  %v79_v53 = vor.u32 %v78_v46, %v77_v38  ;;  %v82_v54 = vor.u32 %v81_v47, %v80_v40  ;;  %v172_v57 = vsel %vm171_vm4, %v170_v36, 0 }
  0x9f   :  { %v85_v55 = vor.u32 %v84_v49, %v83_v42  ;;  %v88_v56 = vor.u32 %v87_v51, %v86_v44  ;;  %vm90_vm6 = vcmp.lt.s32.totalorder %v70_v29, 2  ;;  %v174_v4 = vand.u32 31, %v172_v57 }
  0xa0   :  { %v93_v58 = vsel %vm89_vm2, %v73_v48, %v76_v52  ;;  %v94_v59 = vsel %vm92_vm5, %v82_v54, 2102212464  ;;  %v97_v60 = vsel %vm89_vm2, %v76_v52, %v79_v53  ;;  %v101_v61 = vsel %vm89_vm2, %v79_v53, %v82_v54 }
  0xa1   :  { %v95_v62 = vsel %vm91_vm3, %v79_v53, %v94_v59  ;;  %v98_v63 = vsel %vm92_vm5, %v85_v55, 920167782  ;;  %v102_v0 = vsel %vm92_vm5, %v88_v56, 1326507024  ;;  %v173_v12 = vshrl.u32 %v172_v57, 5 }
  0xa2   :  { %v99_v2 = vsel %vm91_vm3, %v82_v54, %v98_v63  ;;  %v103_v3 = vsel %vm91_vm3, %v85_v55, %v102_v0  ;;  %v96_v5 = vsel %vm90_vm6, %v93_v58, %v95_v62  ;;  %v175_v13 = vsub.s32 32, %v174_v4 }
  0xa3   :  { %v100_v6 = vsel %vm90_vm6, %v97_v60, %v99_v2  ;;  %v104_v7 = vsel %vm90_vm6, %v101_v61, %v103_v3  ;;  %v112_v17 = vmul.u32 %v825_v31, %v96_v5  ;;  %v177_v18 = vshll.u32 %v768_v33, %v174_v4 }
  0xa4   :  { %v838_v8 = vmul.u32.u64.low %v825_v31, %v104_v7  ;;  %v839_v9 = vmul.u32.u64.high %v825_v31, %v104_v7, %v838_v8  ;;  %v842_v10 = vmul.u32.u64.low %v825_v31, %v100_v6  ;;  %v843_v11 = vmul.u32.u64.high %v825_v31, %v100_v6, %v842_v10 }
  0xa5   :  { %v180_v20 = vshll.u32 %v769_v37, %v174_v4  ;;  %v183_v21 = vshll.u32 %v770_v39, %v174_v4  ;;  %v178_v22 = vshrl.u32 %v769_v37, %v175_v13  ;;  %v181_v23 = vshrl.u32 %v770_v39, %v175_v13 }
  0xa6   :  { %v184_v24 = vshrl.u32 %v771_v41, %v175_v13  ;;  %v186_v25 = vshll.u32 %v771_v41, %v174_v4  ;;  %vm114_vm7 = vc.u32 %v839_v9, %v842_v10  ;;  %v115_v27 = vadd.s32 1, %v843_v11 }
  0xa7   :  { %v187_v28 = vshrl.u32 %v772_v43, %v175_v13  ;;  %v189_v29 = vshll.u32 %v772_v43, %v174_v4  ;;  %v179_v30 = vor.u32 %v178_v22, %v177_v18  ;;  %v182_v32 = vor.u32 %v181_v23, %v180_v20 }
  0xa8   :  { %v185_v34 = vor.u32 %v184_v24, %v183_v21  ;;  %v190_v35 = vshrl.u32 %v773_v50, %v175_v13  ;;  %v116_v31 = vsel %vm114_vm7, %v115_v27, %v843_v11  ;;  %vm192_vm8 = vcmp.lt.s32.totalorder %v173_v12, 1 }
  0xa9   :  { %v188_v36 = vor.u32 %v187_v28, %v186_v25  ;;  %vm195_vm9 = vcmp.lt.s32.totalorder %v173_v12, 4  ;;  %v117_v37 = vadd.s32 %v116_v31, %v112_v17  ;;  %vm194_vm10 = vcmp.lt.s32.totalorder %v173_v12, 3 }
  0xaa   :  { %v191_v38 = vor.u32 %v190_v35, %v189_v29  ;;  %v197_v39 = vsel %vm195_vm9, %v185_v34, 2102212464  ;;  %v176_v40 = vshrl.u32 %v768_v33, %v175_v13  ;;  %v200_v41 = vsel %vm192_vm8, %v179_v30, %v182_v32 }
  0xab   :  { %v201_v42 = vsel %vm195_vm9, %v188_v36, 920167782  ;;  %v204_v44 = vsel %vm192_vm8, %v182_v32, %v185_v34  ;;  %v118_v45 = vadd.s32 536870912, %v117_v37  ;;  %vm193_vm11 = vcmp.lt.s32.totalorder %v173_v12, 2 }
  0xac   :  { %v202_v43 = vsel %vm194_vm10, %v185_v34, %v201_v42  ;;  %v205_v46 = vsel %vm195_vm9, %v191_v38, 1326507024  ;;  %v196_v47 = vsel %vm192_vm8, %v176_v40, %v179_v30  ;;  %v198_v48 = vsel %vm194_vm10, %v182_v32, %v197_v39 }
  0xad   :  { %v203_v49 = vsel %vm193_vm11, %v200_v41, %v202_v43  ;;  %v206_v50 = vsel %vm194_vm10, %v188_v36, %v205_v46  ;;  %v119_v51 = vshrl.u32 %v118_v45, 30  ;;  %v199_v57 = vsel %vm193_vm11, %v196_v47, %v198_v48 }
  0xae   :  { %v207_v52 = vsel %vm193_vm11, %v204_v44, %v206_v50  ;;  %v853_v53 = vmul.u32.u64.low %v208_v16, %v203_v49  ;;  %v854_v54 = vmul.u32.u64.high %v208_v16, %v203_v49, %v853_v53  ;;  %v215_v60 = vmul.u32 %v208_v16, %v199_v57 }
  0xaf   :  { %v856_v55 = vmul.u32.u64.low %v208_v16, %v207_v52  ;;  %v857_v56 = vmul.u32.u64.high %v208_v16, %v207_v52, %v856_v55  ;;  %v120_v33 = vshll.u32 %v119_v51, 30  ;;  %v113_v8 = vadd.s32 %v842_v10, %v839_v9 }
  0xb0   :  { %v218_v59 = vadd.s32 1, %v854_v54  ;;  %v143_v42 = vsub.s32 4, %v119_v51  ;;  %vm161_vm2 = vcmp.le.f32.partialorder %v160_v26, 0.7853982  ;;  %v54_v57 = vlaneseq }
  0xb1   :  { %v121_v58 = vsub.s32 %v117_v37, %v120_v33  ;;  %vm217_vm12 = vc.u32 %v857_v56, %v853_v53  ;;  %v216_v32 = vadd.s32 %v853_v53, %v857_v56  ;;  %vm149_vm9 = vweird.f32 %v815_v14 }
  0xb2   :  { %v219_v62 = vsel %vm217_vm12, %v218_v59, %v854_v54  ;;  %v144_v46 = vsel %vm59_vm15, %v143_v42, %v119_v51  ;;  %vm252_vm12 = vweird.f32 %v819_v19 }
  0xb3   :  { %v123_v61 = vsub.s32 0, %v121_v58  ;;  %v220_v63 = vadd.s32 %v219_v62, %v215_v60  ;;  %v146_v49 = vsel %vm868_vm0, 0, %v144_v46  ;;  %v55_v62 = vand.u32 127, %v54_v57 }
  0xb4   :  { %v357_v53 = vadd.s32 3, %v146_v49  ;;  %v150_v60 = vand.u32 3, %v146_v49 }
  0xb5   :  { %v618_v0 = vmin.u32 %v123_v61, %v121_v58  ;;  %v221_v1 = vadd.s32 536870912, %v220_v63  ;;  %vm56_vm8 = vcmp.lt.s32.totalorder %v55_v62, 16  ;;  %vm263_vm10 = vcmp.lt.s32.totalorder %v55_v62, 32 }
  0xb6   :  { %v358_v33 = vand.u32 3, %v357_v53  ;;  %vm152_vm5 = vcmp.eq.s32.totalorder %v150_v60, 0  ;;  %vm155_vm6 = vcmp.eq.s32.totalorder %v150_v60, 2  ;;  %vm151_vm11 = vcmp.lt.s32.totalorder %v150_v60, 2 }
  0xb7   :  { %v125_v2 = vclz %v618_v0  ;;  %v222_v3 = vshrl.u32 %v221_v1, 30 }
  0xb8   :  { %vm360_vm3 = vcmp.eq.s32.totalorder %v358_v33, 0  ;;  %vm363_vm4 = vcmp.eq.s32.totalorder %v358_v33, 2  ;;  %vm359_vm7 = vcmp.lt.s32.totalorder %v358_v33, 2 }
  0xb9   :  { %v619_v4 = vadd.s32 4294967294, %v125_v2  ;;  %v223_v5 = vshll.u32 %v222_v3, 30  ;;  %v246_v15 = vsub.s32 4, %v222_v3 }
  0xbb   :  { %vm620_vm13 = vcmp.lt.s32.totalorder %v619_v4, 0  ;;  %v224_v7 = vsub.s32 %v220_v63, %v223_v5  ;;  %v247_v54 = vsel %vm162_vm1, %v246_v15, %v222_v3 }
  0xbc   :  { %v128_v6 = vsel %vm620_vm13, 0, %v619_v4  ;;  %v249_v56 = vsel %vm161_vm2, 0, %v247_v54 }
  0xbd   :  { %v129_v11 = vsub.s32 32, %v128_v6  ;;  %v133_v12 = vsub.s32 4294967266, %v128_v6  ;;  %v226_v13 = vsub.s32 0, %v224_v7  ;;  %v130_v16 = vshll.u32 %v121_v58, %v128_v6 }
  0xbe   :  { %v461_v61 = vadd.s32 3, %v249_v56  ;;  %v253_v0 = vand.u32 3, %v249_v56 }
  0xbf   :  { %v131_v17 = vshrl.u32 %v113_v8, %v129_v11  ;;  %v134_v18 = vadd.s32 127, %v133_v12  ;;  %v622_v20 = vmin.u32 %v226_v13, %v224_v7 }
  0xc0   :  { %v462_v1 = vand.u32 3, %v461_v61  ;;  %vm258_vm13 = vcmp.eq.s32.totalorder %v253_v0, 2 }
  0xc1   :  { %v132_v21 = vor.u32 %v131_v17, %v130_v16  ;;  %v135_v22 = vshll.u32 %v134_v18, 23  ;;  %v228_v23 = vclz %v622_v20 }
  0xc3   :  { %v136_v24 = vor.u32 4788187, %v135_v22  ;;  %v623_v25 = vadd.s32 4294967294, %v228_v23  ;;  %v139_v28 = vcvt.s32.f32 %v132_v21 }
  0xc5   :  { %v137_v27 = vand.u32 2147483647, %v136_v24  ;;  %vm624_vm14 = vcmp.lt.s32.totalorder %v623_v25, 0 }
  0xc6   :  { %v231_v30 = vsel %vm624_vm14, 0, %v623_v25  ;;  %vm467_vm14 = vcmp.eq.s32.totalorder %v462_v1, 2 }
  0xc7   :  { %v140_v29 = vmul.f32 %v139_v28, %v137_v27  ;;  %v232_v9 = vsub.s32 32, %v231_v30  ;;  %v236_v10 = vsub.s32 4294967266, %v231_v30  ;;  %v233_v35 = vshll.u32 %v224_v7, %v231_v30 }
  0xc9   :  { %v141_v34 = vxor.u32 2147483648, %v140_v29  ;;  %v234_v31 = vshrl.u32 %v216_v32, %v232_v9  ;;  %v237_v36 = vadd.s32 127, %v236_v10  ;;  %v633_v32 = vld [vmem:[%s907_s3] ss:$0 sm:$0xff] }
  0xcb   :  { %v142_v38 = vsel %vm59_vm15, %v141_v34, %v140_v29  ;;  %v235_v40 = vor.u32 %v234_v31, %v233_v35  ;;  %v238_v41 = vshll.u32 %v237_v36, 23  ;;  %vm255_vm15 = vcmp.eq.s32.totalorder %v253_v0, 0 }
  0xcc   :  { %v145_v39 = vsel %vm868_vm0, %v815_v14, %v142_v38  ;;  %vm464_vm0 = vcmp.eq.s32.totalorder %v462_v1, 0 }
  0xcd   :  { %710 = vcosq.f32 %v145_v39  ;;  %v239_v44 = vor.u32 4788187, %v238_v41  ;;  %v242_v43 = vcvt.s32.f32 %v235_v40 }
  0xce   :  { %712 = vsinq.f32 %v145_v39 }
  0xcf   :  { %v240_v45 = vand.u32 2147483647, %v239_v44 }
  0xd1   :  { %v243_v47 = vmul.f32 %v242_v43, %v240_v45 }
  0xd3   :  { %v244_v48 = vxor.u32 2147483648, %v243_v47 }
  0xd5   :  { %v245_v50 = vsel %vm162_vm1, %v244_v48, %v243_v47  ;;  %vm254_vm1 = vcmp.lt.s32.totalorder %v253_v0, 2 }
  0xd6   :  { %v248_v52 = vsel %vm161_vm2, %v819_v19, %v245_v50  ;;  %vm463_vm2 = vcmp.lt.s32.totalorder %v462_v1, 2 }
  0xd7   :  { %714 = vcosq.f32 %v248_v52 }
  0xd8   :  { %716 = vsinq.f32 %v248_v52 }
  0xda   :  { %v711_v55 = vpop.eup %710 }
  0xdb   :  { %v713_v51 = vpop.eup %712  ;;  %v156_v59 = vxor.u32 2147483648, %v711_v55 }
  0xdc   :  { %v153_v58 = vxor.u32 2147483648, %v713_v51 }
  0xdd   :  { %v365_v63 = vsel %vm363_vm4, %v156_v59, %v713_v51  ;;  %v157_v3 = vsel %vm155_vm6, %v156_v59, %v713_v51 }
  0xde   :  { %v362_v26 = vsel %vm360_vm3, %v711_v55, %v153_v58  ;;  %v154_v2 = vsel %vm152_vm5, %v711_v55, %v153_v58 }
  0xdf   :  { %v366_v4 = vsel %vm359_vm7, %v362_v26, %v365_v63  ;;  %v158_v8 = vsel %vm151_vm11, %v154_v2, %v157_v3 }
  0xe0   :  { %v367_v12 = vsel %vm149_vm9, nan, %v366_v4  ;;  %v159_v20 = vsel %vm149_vm9, nan, %v158_v8 }
  0xe1   :  { %v472_v23 = vsel %vm263_vm10, %v367_v12, 0.0 }
  0xe2   :  { %v474_v28 = vsel %vm56_vm8, %v159_v20, %v472_v23 }
  0xe4   :  { %v715_v5 = vpop.eup %714 }
  0xe5   :  { %v717_v6 = vpop.eup %716  ;;  %v259_v7 = vxor.u32 2147483648, %v715_v5 }
  0xe6   :  { %v256_v11 = vxor.u32 2147483648, %v717_v6 }
  0xe7   :  { %v260_v13 = vsel %vm258_vm13, %v259_v7, %v717_v6  ;;  %v469_v16 = vsel %vm467_vm14, %v259_v7, %v717_v6 }
  0xe8   :  { %v257_v17 = vsel %vm255_vm15, %v715_v5, %v256_v11  ;;  %v466_v18 = vsel %vm464_vm0, %v715_v5, %v256_v11 }
  0xe9   :  { %v261_v21 = vsel %vm254_vm1, %v257_v17, %v260_v13  ;;  %v470_v22 = vsel %vm463_vm2, %v466_v18, %v469_v16 }
  0xea   :  { %v262_v24 = vsel %vm252_vm12, nan, %v261_v21  ;;  %v471_v25 = vsel %vm252_vm12, nan, %v470_v22 }
  0xeb   :  { %v473_v27 = vsel %vm263_vm10, %v471_v25, 0.0 }
  0xec   :  { %v475_v29 = vsel %vm56_vm8, %v262_v24, %v473_v27 }
  0xed   :  { %v476_v30 = vpack.c.bf16 %v475_v29, %v474_v28 }
  0xef   :  { %677 = vmatmul.mubr.bf16.vlgmr.msra.gmra.mxu0 %v476_v30 }
 0x1af   :  { %v582_v14 = vpop.f32.mrf.mxu0 }
 0x1b0   :  { %v583_v34 = vadd.f32 %v633_v32, %v582_v14 }
 0x1b1   :  { %v678_v9 = vpop.f32.mrf.mxu0 }
 0x1b3   :  { %v585_v10 = vpop.f32.mrf.mxu0 }
 0x1b4   :  { %v586_v19 = vadd.f32 %v633_v32, %v585_v10 }
 0x1b5   :  { %v679_v35 = vpop.f32.mrf.mxu0 }
 0x1b6   :  { %v649_v31 = vpack.c.bf16 %v586_v19, %v583_v34 }
 0x1b8   :  { %650 = vst [vmem:[#allocation5] sm:$0xff] %v649_v31  }
 0x1b9   :  { %749 = shalt.err (!%p746_p9)
}
 0x1ba   :  { %610 = dma.vmem_to_hbm [thread:$0]  %s605_s28, 128, %s908_s4, [#allocation4], %s763_s18, %s763_s18, %s764_s19  }
 0x1bb   :  { %760 = dma.done.wait [#allocation4], 128  }
 0x1bc   :  { %761 = vsyncadd [#allocation4], 4294967168 }
 0x1bd   :  { %614 = vsyncpa [#allocation3], 1 }
 0x1be   :  { %615 = vsyncpa [#allocation4], 1 }

</bundles_post_ra>
